<compile_context>
chip_gen: v6e
topology: v6e:2x2x1
jax: 0.10.0
libtpu: 0.0.40
codegen_flags: <defaults>
</compile_context>

<pallas_src>
import functools
import math

import jax
import jax.numpy as jnp
from jax.experimental import pallas as pl
from jax.experimental.pallas import tpu as pltpu

# Demo size (PyTorch default is dim=512; kept small but lane-aligned at 128).
DIM = 128

_LANE = 128
_SUBLANE = 8
_TM_MAX = 2048
# Conservative working-set budget valid across v5e / v6e / v7x scoped VMEM.
_VMEM_WORK_BUDGET = 26 * 1024 * 1024
_VMEM_LIMIT_BYTES = 48 * 1024 * 1024   # explicit scoped limit (< v7x 64 MiB)


def _cdiv(a, b):
    return (a + b - 1) // b


def _round_up(a, b):
    return _cdiv(a, b) * b


def _concat_linear_kernel(x_ref, y_ref, wt_ref, b_ref, o_ref, *, dim):
    # x_ref, y_ref: (TM, dim)   wt_ref: (2*dim, TN) = W^T   b_ref: (1, TN)
    # o_ref: (TM, TN)
    #
    # cat([x, y], -1) @ W^T == x @ W^T[:dim] + y @ W^T[dim:]
    # Static, tile-aligned sublane slices of the resident W^T slab — no concat,
    # no transpose, two full MXU dots with f32 accumulation.
    acc = jnp.dot(x_ref[...], wt_ref[pl.ds(0, dim), :],
                  preferred_element_type=jnp.float32)
    acc = acc + jnp.dot(y_ref[...], wt_ref[pl.ds(dim, dim), :],
                        preferred_element_type=jnp.float32)
    o_ref[...] = (acc + b_ref[...]).astype(o_ref.dtype)


def prepare_params(w, b):
    """One-time parameter prep (hoisted off the hot path).

    w: (dim, 2*dim) PyTorch nn.Linear layout; b: (dim,).
    Returns (W^T slab of shape (2*dim, dim), bias row of shape (1, dim)).
    """
    dim = w.shape[0]
    assert w.shape == (dim, 2 * dim) and b.shape == (dim,)
    return jnp.transpose(w), b.reshape(1, dim)


def _choose_tiles(M, D, itemsize):
    # Resident (single-buffered) operands: W^T (2D, D) + bias row.
    resident = 2 * D * D * itemsize + D * itemsize
    avail = max(_VMEM_WORK_BUDGET - resident, 2 * 1024 * 1024)
    per_row = 3 * 2 * D * itemsize            # x, y, out tiles, double-buffered
    tm = min(avail // per_row, _TM_MAX, _round_up(M, _SUBLANE))
    tm = max(_SUBLANE, (tm // _SUBLANE) * _SUBLANE)
    # Prefer >= 2 row tiles (megacore / v7x dual-TC) when there are enough rows.
    if M > 2 * _SUBLANE and _cdiv(M, tm) < 2:
        tm = max(_SUBLANE, _round_up(_cdiv(M, 2), _SUBLANE))
    # If a single row tile is unavoidable, split output columns instead so a
    # second parallel grid axis exists (and the per-step weight block shrinks).
    tn = D
    if _cdiv(M, tm) == 1 and D >= 2 * _LANE and D % (2 * _LANE) == 0:
        tn = D // 2
    return int(tm), int(tn)


def _build_call(M, D, TM, TN, out_dtype, single_buffer_resident):
    kernel = functools.partial(_concat_linear_kernel, dim=D)
    res_kwargs = dict(pipeline_mode=pl.Buffered(1)) if single_buffer_resident else {}
    grid = (pl.cdiv(M, TM), pl.cdiv(D, TN))
    return pl.pallas_call(
        kernel,
        out_shape=jax.ShapeDtypeStruct((M, D), out_dtype),
        grid_spec=pltpu.PrefetchScalarGridSpec(
            num_scalar_prefetch=0,
            grid=grid,
            in_specs=[
                pl.BlockSpec((TM, D), lambda i, j: (i, 0)),                    # x rows
                pl.BlockSpec((TM, D), lambda i, j: (i, 0)),                    # y rows
                pl.BlockSpec((2 * D, TN), lambda i, j: (0, j), **res_kwargs),  # W^T
                pl.BlockSpec((1, TN), lambda i, j: (0, j), **res_kwargs),      # bias
            ],
            out_specs=pl.BlockSpec((TM, TN), lambda i, j: (i, j)),
        ),
        compiler_params=pltpu.CompilerParams(
            dimension_semantics=("parallel", "parallel"),
            vmem_limit_bytes=_VMEM_LIMIT_BYTES,
        ),
    )


def concat_linear_fusion(x, y, wt, b_row):
    """x, y: (..., dim). wt: (2*dim, dim) = W^T (from prepare_params). b_row: (1, dim)."""
    *lead, D = x.shape
    assert x.shape == y.shape
    assert wt.shape == (2 * D, D) and b_row.shape == (1, D)
    M = math.prod(lead) if lead else 1

    # Flatten leading dims so the MXU sees large, lane-dense row tiles.
    x2 = x.reshape(M, D)
    y2 = y.reshape(M, D)

    TM, TN = _choose_tiles(M, D, jnp.dtype(x.dtype).itemsize)
    # Weight / bias blocks are grid-invariant only when the full column width is
    # resident (TN == D); only single-buffer them in that case.
    single_buffer = (TN == D)
    try:
        out = _build_call(M, D, TM, TN, x.dtype, single_buffer)(x2, y2, wt, b_row)
    except Exception:
        if not single_buffer:
            raise
        # Fallback: default double-buffering if Buffered(1) is not accepted.
        out = _build_call(M, D, TM, TN, x.dtype, False)(x2, y2, wt, b_row)

    return out.reshape(*lead, D)


def reference(x, y, w, b):
    # Pure-JAX reference mirroring the PyTorch module exactly.
    concat = jnp.concatenate([x, y], axis=-1)
    return jnp.einsum("...k,nk->...n", concat, w) + b


if __name__ == "__main__":
    key = jax.random.PRNGKey(0)
    k_x, k_y, k_w, k_b, k_xt, k_yt = jax.random.split(key, 6)

    B, S = 2, 8
    x = jax.random.normal(k_x, (B, S, DIM), dtype=jnp.float32)
    y = jax.random.normal(k_y, (B, S, DIM), dtype=jnp.float32)

    # Deterministic init matching nn.Linear defaults: U(-1/sqrt(fan_in), ...).
    bound = 1.0 / math.sqrt(2 * DIM)
    w = jax.random.uniform(k_w, (DIM, 2 * DIM), dtype=jnp.float32,
                           minval=-bound, maxval=bound)
    b = jax.random.uniform(k_b, (DIM,), dtype=jnp.float32,
                           minval=-bound, maxval=bound)

    # One-time parameter prep (transpose hoisted out of the per-call hot path).
    wt, b_row = jax.block_until_ready(prepare_params(w, b))

    out = concat_linear_fusion(x, y, wt, b_row)
    out = jax.block_until_ready(out)

    ref = reference(x, y, w, b)
    assert out.shape == (B, S, DIM)
    assert jnp.allclose(out, ref, atol=1e-4, rtol=1e-4), \
        "mismatch vs pure-JAX reference"

    # Ragged-tail check: a row count that is not a multiple of the tile
    # exercises the masked last-block stores that replaced the pad/slice path.
    Mt = 20
    xt = jax.random.normal(k_xt, (Mt, DIM), dtype=jnp.float32)
    yt = jax.random.normal(k_yt, (Mt, DIM), dtype=jnp.float32)
    out_t = jax.block_until_ready(concat_linear_fusion(xt, yt, wt, b_row))
    ref_t = reference(xt, yt, w, b)
    assert out_t.shape == (Mt, DIM)
    assert jnp.allclose(out_t, ref_t, atol=1e-4, rtol=1e-4), \
        "ragged-tail mismatch vs pure-JAX reference"

    print("KERNEL_OK")
</pallas_src>

<mosaic_0001>
module attributes {stable_mosaic.version = 11 : i64} {
  func.func @_concat_linear_kernel(%arg0: i32, %arg1: i32, %arg2: memref<16x128xf32, #tpu.memory_space<vmem>>, %arg3: memref<16x128xf32, #tpu.memory_space<vmem>>, %arg4: memref<256x128xf32, #tpu.memory_space<vmem>>, %arg5: memref<1x128xf32, #tpu.memory_space<vmem>>, %arg6: memref<16x128xf32, #tpu.memory_space<vmem>>) attributes {dimension_semantics = [#tpu.dimension_semantics<parallel>, #tpu.dimension_semantics<parallel>], iteration_bounds = array<i64: 1, 1>, scalar_prefetch = 0 : i64, scratch_operands = 0 : i64, tpu.core_type = #tpu.core_type<tc>, window_params = [{transform_indices = @transform_0, window_bounds = array<i64: 16, 128>}, {transform_indices = @transform_1, window_bounds = array<i64: 16, 128>}, {pipeline_mode = #tpu.pipeline_mode<synchronous>, transform_indices = @transform_2, window_bounds = array<i64: 256, 128>}, {pipeline_mode = #tpu.pipeline_mode<synchronous>, transform_indices = @transform_3, window_bounds = array<i64: 1, 128>}, {transform_indices = @transform_4, window_bounds = array<i64: 16, 128>}]} {
    %c0 = arith.constant 0 : index
    %c0_0 = arith.constant 0 : index
    %0 = vector.load %arg2[%c0, %c0_0] : memref<16x128xf32, #tpu.memory_space<vmem>>, vector<16x128xf32>
    %c0_1 = arith.constant 0 : index
    %c0_2 = arith.constant 0 : index
    %1 = vector.load %arg4[%c0_1, %c0_2] : memref<256x128xf32, #tpu.memory_space<vmem>>, vector<128x128xf32>
    %cst = arith.constant dense<0.000000e+00> : vector<16x128xf32>
    %2 = tpu.matmul %0, %1, %cst {dimension_numbers = #tpu.dot_dimension_numbers<[1], [0], [0], [1], [0, 0, 1, 1], [], []>} : vector<16x128xf32>, vector<128x128xf32>, vector<16x128xf32> -> vector<16x128xf32>
    %c0_3 = arith.constant 0 : index
    %c0_4 = arith.constant 0 : index
    %3 = vector.load %arg3[%c0_3, %c0_4] : memref<16x128xf32, #tpu.memory_space<vmem>>, vector<16x128xf32>
    %c128 = arith.constant 128 : index
    %c0_5 = arith.constant 0 : index
    %4 = vector.load %arg4[%c128, %c0_5] : memref<256x128xf32, #tpu.memory_space<vmem>>, vector<128x128xf32>
    %cst_6 = arith.constant dense<0.000000e+00> : vector<16x128xf32>
    %5 = tpu.matmul %3, %4, %cst_6 {dimension_numbers = #tpu.dot_dimension_numbers<[1], [0], [0], [1], [0, 0, 1, 1], [], []>} : vector<16x128xf32>, vector<128x128xf32>, vector<16x128xf32> -> vector<16x128xf32>
    %6 = arith.addf %2, %5 : vector<16x128xf32>
    %c0_7 = arith.constant 0 : index
    %c0_8 = arith.constant 0 : index
    %7 = vector.load %arg5[%c0_7, %c0_8] : memref<1x128xf32, #tpu.memory_space<vmem>>, vector<1x128xf32>
    %8 = vector.broadcast %7 : vector<1x128xf32> to vector<16x128xf32>
    %9 = arith.addf %6, %8 : vector<16x128xf32>
    %c0_9 = arith.constant 0 : index
    %c0_10 = arith.constant 0 : index
    %10 = vector.load %arg6[%c0_9, %c0_10] : memref<16x128xf32, #tpu.memory_space<vmem>>, vector<16x128xf32>
    tpu.vector_store %arg6[%c0_9, %c0_10], %9 {strides = array<i32>} : memref<16x128xf32, #tpu.memory_space<vmem>>, vector<16x128xf32>,
    return
  }
  func.func @transform_0(%arg0: i32, %arg1: i32) -> (i32, i32) {
    %c0_i32 = arith.constant 0 : i32
    %c0_i32_0 = arith.constant 0 : i32
    return %arg0, %c0_i32 : i32, i32
  }
  func.func @transform_1(%arg0: i32, %arg1: i32) -> (i32, i32) {
    %c0_i32 = arith.constant 0 : i32
    %c0_i32_0 = arith.constant 0 : i32
    return %arg0, %c0_i32 : i32, i32
  }
  func.func @transform_2(%arg0: i32, %arg1: i32) -> (i32, i32) {
    %c0_i32 = arith.constant 0 : i32
    %c0_i32_0 = arith.constant 0 : i32
    return %c0_i32, %arg1 : i32, i32
  }
  func.func @transform_3(%arg0: i32, %arg1: i32) -> (i32, i32) {
    %c0_i32 = arith.constant 0 : i32
    %c0_i32_0 = arith.constant 0 : i32
    return %c0_i32, %arg1 : i32, i32
  }
  func.func @transform_4(%arg0: i32, %arg1: i32) -> (i32, i32) {
    %c0_i32 = arith.constant 0 : i32
    return %arg0, %arg1 : i32, i32
  }
}

module attributes {stable_mosaic.version = 11 : i64} {
  func.func @_concat_linear_kernel(%arg0: i32, %arg1: i32, %arg2: memref<16x128xf32, #tpu.memory_space<vmem>>, %arg3: memref<16x128xf32, #tpu.memory_space<vmem>>, %arg4: memref<256x128xf32, #tpu.memory_space<vmem>>, %arg5: memref<1x128xf32, #tpu.memory_space<vmem>>, %arg6: memref<16x128xf32, #tpu.memory_space<vmem>>) attributes {dimension_semantics = [#tpu.dimension_semantics<parallel>, #tpu.dimension_semantics<parallel>], iteration_bounds = array<i64: 1, 1>, scalar_prefetch = 0 : i64, scratch_operands = 0 : i64, tpu.core_type = #tpu.core_type<tc>, window_params = [{transform_indices = @transform_0, window_bounds = array<i64: 16, 128>}, {transform_indices = @transform_1, window_bounds = array<i64: 16, 128>}, {transform_indices = @transform_2, window_bounds = array<i64: 256, 128>}, {transform_indices = @transform_3, window_bounds = array<i64: 1, 128>}, {transform_indices = @transform_4, window_bounds = array<i64: 16, 128>}]} {
    %c0 = arith.constant 0 : index
    %c0_0 = arith.constant 0 : index
    %0 = vector.load %arg2[%c0, %c0_0] : memref<16x128xf32, #tpu.memory_space<vmem>>, vector<16x128xf32>
    %c0_1 = arith.constant 0 : index
    %c0_2 = arith.constant 0 : index
    %1 = vector.load %arg4[%c0_1, %c0_2] : memref<256x128xf32, #tpu.memory_space<vmem>>, vector<128x128xf32>
    %cst = arith.constant dense<0.000000e+00> : vector<16x128xf32>
    %2 = tpu.matmul %0, %1, %cst {dimension_numbers = #tpu.dot_dimension_numbers<[1], [0], [0], [1], [0, 0, 1, 1], [], []>} : vector<16x128xf32>, vector<128x128xf32>, vector<16x128xf32> -> vector<16x128xf32>
    %c0_3 = arith.constant 0 : index
    %c0_4 = arith.constant 0 : index
    %3 = vector.load %arg3[%c0_3, %c0_4] : memref<16x128xf32, #tpu.memory_space<vmem>>, vector<16x128xf32>
    %c128 = arith.constant 128 : index
    %c0_5 = arith.constant 0 : index
    %4 = vector.load %arg4[%c128, %c0_5] : memref<256x128xf32, #tpu.memory_space<vmem>>, vector<128x128xf32>
    %cst_6 = arith.constant dense<0.000000e+00> : vector<16x128xf32>
    %5 = tpu.matmul %3, %4, %cst_6 {dimension_numbers = #tpu.dot_dimension_numbers<[1], [0], [0], [1], [0, 0, 1, 1], [], []>} : vector<16x128xf32>, vector<128x128xf32>, vector<16x128xf32> -> vector<16x128xf32>
    %6 = arith.addf %2, %5 : vector<16x128xf32>
    %c0_7 = arith.constant 0 : index
    %c0_8 = arith.constant 0 : index
    %7 = vector.load %arg5[%c0_7, %c0_8] : memref<1x128xf32, #tpu.memory_space<vmem>>, vector<1x128xf32>
    %8 = vector.broadcast %7 : vector<1x128xf32> to vector<16x128xf32>
    %9 = arith.addf %6, %8 : vector<16x128xf32>
    %c0_9 = arith.constant 0 : index
    %c0_10 = arith.constant 0 : index
    %10 = vector.load %arg6[%c0_9, %c0_10] : memref<16x128xf32, #tpu.memory_space<vmem>>, vector<16x128xf32>
    tpu.vector_store %arg6[%c0_9, %c0_10], %9 {strides = array<i32>} : memref<16x128xf32, #tpu.memory_space<vmem>>, vector<16x128xf32>,
    return
  }
  func.func @transform_0(%arg0: i32, %arg1: i32) -> (i32, i32) {
    %c0_i32 = arith.constant 0 : i32
    %c0_i32_0 = arith.constant 0 : i32
    return %arg0, %c0_i32 : i32, i32
  }
  func.func @transform_1(%arg0: i32, %arg1: i32) -> (i32, i32) {
    %c0_i32 = arith.constant 0 : i32
    %c0_i32_0 = arith.constant 0 : i32
    return %arg0, %c0_i32 : i32, i32
  }
  func.func @transform_2(%arg0: i32, %arg1: i32) -> (i32, i32) {
    %c0_i32 = arith.constant 0 : i32
    %c0_i32_0 = arith.constant 0 : i32
    return %c0_i32, %arg1 : i32, i32
  }
  func.func @transform_3(%arg0: i32, %arg1: i32) -> (i32, i32) {
    %c0_i32 = arith.constant 0 : i32
    %c0_i32_0 = arith.constant 0 : i32
    return %c0_i32, %arg1 : i32, i32
  }
  func.func @transform_4(%arg0: i32, %arg1: i32) -> (i32, i32) {
    %c0_i32 = arith.constant 0 : i32
    return %arg0, %arg1 : i32, i32
  }
}

</mosaic_0001>

<bundles_post_ra>
// kernel: tpu_custom_call.1
= control target key start
LH: loop header
LB: loop body
LE: loop exit
PB: predicated region body
PF: predicated region fallthrough
CT: control target
= control target key end

     0   :  { %9 = vsyncpa [#allocation3], 0  ;;  %s531_s0 = inlined_call_operand.hbm [shape: f32[16,128], index: 0, kind: input, shape index: {}]   ;;  %s532_s1 = inlined_call_operand.hbm [shape: f32[16,128], index: 1, kind: input, shape index: {}]   ;;  %s533_s2 = inlined_call_operand.hbm [shape: f32[256,128], index: 2, kind: input, shape index: {}]   ;;  %s534_s3 = inlined_call_operand.vmem [shape: f32[1,128], index: 3, kind: input, shape index: {}]   ;;  %s535_s4 = inlined_call_operand.hbm [shape: f32[16,128], index: 4, kind: output, shape index: {}]  }
   0x1   :  { %10 = vsyncpa [#allocation6], 0 }
   0x2   :  { %11 = vsyncpa [#allocation4], 0  ;;  %s473_s15 = smov [#allocation5]   ;;  %s474_s17 = smov [#allocation2]  }
   0x3   :  { %s29_s16 = sshll.u32 %s473_s15, 4  ;;  %s17_s18 = sshll.u32 %s474_s17, 4  ;;  %s30_s16 = int_to_ptr.vmem [resolvable:$true] %s29_s16  ;;  %s18_s18 = int_to_ptr.vmem [resolvable:$true] %s17_s18 }
   0x4   :  { %s395_s19 = scalar_lea.vmem %s30_s16, 256  ;;  %p400_p1 = scmp.lt.s32.totalorder %s30_s16, %s30_s16 }
   0x5   :  { %p396_p0 = scmp.ne.s32.totalorder %s30_s16, %s395_s19  ;;  %p401_p2 = scmp.lt.s32.totalorder %s395_s19, %s395_s19 }
   0x7   :  { %p402_p3 = por %p401_p2, %p400_p1 }
   0x9   :  { %p403_p4 = pnand %p402_p3, %p396_p0 }
   0xb   :  { %406 = shalt.err (!%p403_p4)
}
   0xc   :  { %s475_s20 = smov 128   ;;  %s476_s21 = smov 8  }
   0xd   :  { %35 = dma.hbm_to_vmem [thread:$0]  %s532_s1, 256, %s30_s16, [#allocation6], %s475_s20, %s475_s20, %s476_s21  }
   0xe   :  { %s415_s24 = scalar_lea.vmem %s18_s18, 256  ;;  %p420_p6 = scmp.lt.s32.totalorder %s18_s18, %s18_s18 }
   0xf   :  { %p416_p5 = scmp.ne.s32.totalorder %s18_s18, %s415_s24  ;;  %p421_p7 = scmp.lt.s32.totalorder %s415_s24, %s415_s24 }
  0x11   :  { %p422_p8 = por %p421_p7, %p420_p6 }
  0x13   :  { %p423_p9 = pnand %p422_p8, %p416_p5 }
  0x15   :  { %426 = shalt.err (!%p423_p9)
}
  0x16   :  { %23 = dma.hbm_to_vmem [thread:$0]  %s531_s0, 256, %s18_s18, [#allocation3], %s475_s20, %s475_s20, %s476_s21  }
  0x17   :  { %s477_s27 = smov [#allocation7]  }
  0x18   :  { %s41_s28 = sshll.u32 %s477_s27, 4  ;;  %s42_s28 = int_to_ptr.vmem [resolvable:$true] %s41_s28 }
  0x19   :  { %s435_s29 = scalar_lea.vmem %s42_s28, 4096  ;;  %p440_p11 = scmp.lt.s32.totalorder %s42_s28, %s42_s28 }
  0x1a   :  { %p436_p10 = scmp.ne.s32.totalorder %s42_s28, %s435_s29  ;;  %p441_p12 = scmp.lt.s32.totalorder %s435_s29, %s435_s29 }
  0x1c   :  { %p442_p13 = por %p441_p12, %p440_p11 }
  0x1e   :  { %p443_p0 = pnand %p442_p13, %p436_p10 }
  0x20   :  { %446 = shalt.err (!%p443_p0)
}
  0x21   :  { %47 = dma.hbm_to_vmem [thread:$0]  %s533_s2, 4096, %s42_s28, [#allocation6], %s475_s20, %s475_s20, %s476_s21  }
  0x22   :  { %467 = dma.done.wait [#allocation3], 256  }
  0x23   :  { %468 = vsyncadd [#allocation3], 4294967040 }
  0x24   :  { %469 = dma.done.wait [#allocation6], 4352  }
  0x25   :  { %470 = vsyncadd [#allocation6], 4294962944  ;;  %v94_v0 = vld [vmem:[#allocation7 + $0xf8] sm:$0xff]  ;;  %v93_v2 = vld [vmem:[#allocation7 + $0xf0] sm:$0xff]  ;;  %s478_s5 = smov [#allocation8]  }
  0x26   :  { %v76_v1 = vld [vmem:[#allocation7 + $0x78] sm:$0xff]  ;;  %311 = vmatprep.subr.mxu0 %v94_v0  ;;  %v75_v3 = vld [vmem:[#allocation7 + $0x70] sm:$0xff]  ;;  %v92_v4 = vld [vmem:[#allocation7 + $0xe8] sm:$0xff]  ;;  %s261_s6 = sshll.u32 %s478_s5, 4  ;;  %s262_s6 = int_to_ptr.vmem [resolvable:$true] %s261_s6 }
  0x27   :  { %346 = vmatprep.subr.mxu1 %v76_v1  ;;  %312 = vmatpush3.msra.mxu0 %v94_v0  ;;  %v74_v5 = vld [vmem:[#allocation7 + $0x68] sm:$0xff]  ;;  %v91_v6 = vld [vmem:[#allocation7 + $0xe0] sm:$0xff]  ;;  %v90_v8 = vld [vmem:[#allocation7 + $0xd8] sm:$0xff]  ;;  %s447_s7 = scalar_lea.vmem %s262_s6, 256  ;;  %p452_p2 = scmp.lt.s32.totalorder %s262_s6, %s262_s6 }
  0x28   :  { %347 = vmatpush3.msra.mxu1 %v76_v1  ;;  %313 = vmatprep.subr.mxu0 %v93_v2  ;;  %v73_v7 = vld [vmem:[#allocation7 + $0x60] sm:$0xff]  ;;  %v72_v9 = vld [vmem:[#allocation7 + $0x58] sm:$0xff]  ;;  %v89_v10 = vld [vmem:[#allocation7 + $0xd0] sm:$0xff]  ;;  %p448_p1 = scmp.ne.s32.totalorder %s262_s6, %s447_s7  ;;  %p453_p3 = scmp.lt.s32.totalorder %s447_s7, %s447_s7 }
  0x29   :  { %348 = vmatprep.subr.mxu1 %v75_v3  ;;  %314 = vmatpush3.msra.mxu0 %v93_v2  ;;  %v71_v11 = vld [vmem:[#allocation7 + $0x50] sm:$0xff]  ;;  %v88_v12 = vld [vmem:[#allocation7 + $0xc8] sm:$0xff]  ;;  %v87_v14 = vld [vmem:[#allocation7 + $0xc0] sm:$0xff] }
  0x2a   :  { %349 = vmatpush3.msra.mxu1 %v75_v3  ;;  %315 = vmatprep.subr.mxu0 %v92_v4  ;;  %v70_v13 = vld [vmem:[#allocation7 + $0x48] sm:$0xff]  ;;  %v69_v15 = vld [vmem:[#allocation7 + $0x40] sm:$0xff]  ;;  %v86_v16 = vld [vmem:[#allocation7 + $0xb8] sm:$0xff]  ;;  %p454_p4 = por %p453_p3, %p452_p2 }
  0x2b   :  { %350 = vmatprep.subr.mxu1 %v74_v5  ;;  %316 = vmatpush3.msra.mxu0 %v92_v4  ;;  %v68_v17 = vld [vmem:[#allocation7 + $0x38] sm:$0xff]  ;;  %v85_v18 = vld [vmem:[#allocation7 + $0xb0] sm:$0xff]  ;;  %v84_v20 = vld [vmem:[#allocation7 + $0xa8] sm:$0xff] }
  0x2c   :  { %351 = vmatpush3.msra.mxu1 %v74_v5  ;;  %317 = vmatprep.subr.mxu0 %v91_v6  ;;  %v67_v19 = vld [vmem:[#allocation7 + $0x30] sm:$0xff]  ;;  %v66_v21 = vld [vmem:[#allocation7 + $0x28] sm:$0xff]  ;;  %v83_v22 = vld [vmem:[#allocation7 + $0xa0] sm:$0xff]  ;;  %p455_p5 = pnand %p454_p4, %p448_p1 }
  0x2d   :  { %352 = vmatprep.subr.mxu1 %v73_v7  ;;  %318 = vmatpush3.msra.mxu0 %v91_v6  ;;  %v65_v23 = vld [vmem:[#allocation7 + $0x20] sm:$0xff]  ;;  %v82_v24 = vld [vmem:[#allocation7 + $0x98] sm:$0xff]  ;;  %v81_v26 = vld [vmem:[#allocation7 + $0x90] sm:$0xff] }
  0x2e   :  { %353 = vmatpush3.msra.mxu1 %v73_v7  ;;  %319 = vmatprep.subr.mxu0 %v90_v8  ;;  %v64_v25 = vld [vmem:[#allocation7 + $0x18] sm:$0xff]  ;;  %v63_v27 = vld [vmem:[#allocation7 + $0x10] sm:$0xff]  ;;  %v80_v28 = vld [vmem:[#allocation7 + $0x88] sm:$0xff] }
  0x2f   :  { %354 = vmatprep.subr.mxu1 %v72_v9  ;;  %320 = vmatpush3.msra.mxu0 %v90_v8  ;;  %v62_v29 = vld [vmem:[#allocation7 + $0x8] sm:$0xff]  ;;  %v79_v30 = vld [vmem:[#allocation7 + $0x80] sm:$0xff]  ;;  %v77_v32 = vld [vmem:[#allocation5] sm:$0xff] }
  0x30   :  { %355 = vmatpush3.msra.mxu1 %v72_v9  ;;  %321 = vmatprep.subr.mxu0 %v89_v10  ;;  %v61_v31 = vld [vmem:[#allocation7] sm:$0xff]  ;;  %v78_v34 = vld [vmem:[#allocation5 + $0x8] sm:$0xff]  ;;  %v60_v35 = vld [vmem:[#allocation2 + $0x8] sm:$0xff] }
  0x31   :  { %356 = vmatprep.subr.mxu1 %v71_v11  ;;  %322 = vmatpush3.msra.mxu0 %v89_v10  ;;  %v59_v33 = vld [vmem:[#allocation2] sm:$0xff] }
  0x32   :  { %357 = vmatpush3.msra.mxu1 %v71_v11  ;;  %323 = vmatprep.subr.mxu0 %v88_v12  ;;  %v274_v38 = vld [vmem:[%s534_s3] ss:$0 sm:$0xff] }
  0x33   :  { %358 = vmatprep.subr.mxu1 %v70_v13  ;;  %324 = vmatpush3.msra.mxu0 %v88_v12 }
  0x34   :  { %359 = vmatpush3.msra.mxu1 %v70_v13  ;;  %325 = vmatprep.subr.mxu0 %v87_v14 }
  0x35   :  { %360 = vmatprep.subr.mxu1 %v69_v15  ;;  %326 = vmatpush3.msra.mxu0 %v87_v14 }
  0x36   :  { %361 = vmatpush3.msra.mxu1 %v69_v15  ;;  %327 = vmatprep.subr.mxu0 %v86_v16 }
  0x37   :  { %362 = vmatprep.subr.mxu1 %v68_v17  ;;  %328 = vmatpush3.msra.mxu0 %v86_v16 }
  0x38   :  { %363 = vmatpush3.msra.mxu1 %v68_v17  ;;  %329 = vmatprep.subr.mxu0 %v85_v18 }
  0x39   :  { %364 = vmatprep.subr.mxu1 %v67_v19  ;;  %330 = vmatpush3.msra.mxu0 %v85_v18 }
  0x3a   :  { %365 = vmatpush3.msra.mxu1 %v67_v19  ;;  %331 = vmatprep.subr.mxu0 %v84_v20 }
  0x3b   :  { %366 = vmatprep.subr.mxu1 %v66_v21  ;;  %332 = vmatpush3.msra.mxu0 %v84_v20 }
  0x3c   :  { %367 = vmatpush3.msra.mxu1 %v66_v21  ;;  %333 = vmatprep.subr.mxu0 %v83_v22 }
  0x3d   :  { %368 = vmatprep.subr.mxu1 %v65_v23  ;;  %334 = vmatpush3.msra.mxu0 %v83_v22 }
  0x3e   :  { %369 = vmatpush3.msra.mxu1 %v65_v23  ;;  %335 = vmatprep.subr.mxu0 %v82_v24 }
  0x3f   :  { %370 = vmatprep.subr.mxu1 %v64_v25  ;;  %336 = vmatpush3.msra.mxu0 %v82_v24 }
  0x40   :  { %371 = vmatpush3.msra.mxu1 %v64_v25  ;;  %337 = vmatprep.subr.mxu0 %v81_v26 }
  0x41   :  { %372 = vmatprep.subr.mxu1 %v63_v27  ;;  %338 = vmatpush3.msra.mxu0 %v81_v26 }
  0x42   :  { %373 = vmatpush3.msra.mxu1 %v63_v27  ;;  %339 = vmatprep.subr.mxu0 %v80_v28 }
  0x43   :  { %374 = vmatprep.subr.mxu1 %v62_v29  ;;  %340 = vmatpush3.msra.mxu0 %v80_v28 }
  0x44   :  { %375 = vmatpush3.msra.mxu1 %v62_v29  ;;  %341 = vmatprep.subr.mxu0 %v79_v30 }
  0x45   :  { %376 = vmatprep.subr.mxu1 %v61_v31  ;;  %342 = vmatpush3.msra.mxu0 %v79_v30 }
  0x46   :  { %343 = vmatprep.mubr.f32.mxu0 %v77_v32  ;;  %377 = vmatpush3.msra.mxu1 %v61_v31 }
  0x47   :  { %378 = vmatprep.mubr.f32.mxu1 %v59_v33  ;;  %344 = vmatmul.mubr.f32.vlgmr.msra.gmra.mxu0 %v78_v34 }
  0x48   :  { %379 = vmatmul.mubr.f32.vlgmr.msra.gmra.mxu1 %v60_v35 }
 0x107   :  { %v345_v36 = vpop.f32.mrf.mxu0 }
 0x108   :  { %v380_v37 = vpop.f32.mrf.mxu1 }
 0x109   :  { %v242_v39 = vadd.f32 %v380_v37, %v345_v36  ;;  %v161_v40 = vpop.f32.mrf.mxu0 }
 0x10a   :  { %v236_v41 = vpop.f32.mrf.mxu1 }
 0x10b   :  { %v253_v42 = vadd.f32 %v274_v38, %v242_v39  ;;  %v237_v43 = vadd.f32 %v236_v41, %v161_v40 }
 0x10d   :  { %255 = vst [vmem:[#allocation8 + $0x8] sm:$0xff] %v253_v42  ;;  %v252_v44 = vadd.f32 %v274_v38, %v237_v43 }
 0x10f   :  { %254 = vst [vmem:[#allocation8] sm:$0xff] %v252_v44 }
 0x110   :  { %458 = shalt.err (!%p455_p5)
}
 0x111   :  { %267 = dma.vmem_to_hbm [thread:$0]  %s262_s6, 256, %s535_s4, [#allocation4], %s475_s20, %s475_s20, %s476_s21  }
 0x112   :  { %471 = dma.done.wait [#allocation4], 256  }
 0x113   :  { %472 = vsyncadd [#allocation4], 4294967040 }
 0x114   :  { %271 = vsyncpa [#allocation3], 1 }
 0x115   :  { %272 = vsyncpa [#allocation6], 1 }
 0x116   :  { %273 = vsyncpa [#allocation4], 1 }

// kernel: tpu_custom_call.1
= control target key start
LH: loop header
LB: loop body
LE: loop exit
PB: predicated region body
PF: predicated region fallthrough
CT: control target
= control target key end

     0   :  { %9 = vsyncpa [#allocation3], 0  ;;  %s531_s0 = inlined_call_operand.hbm [shape: f32[16,128], index: 0, kind: input, shape index: {}]   ;;  %s532_s1 = inlined_call_operand.hbm [shape: f32[16,128], index: 1, kind: input, shape index: {}]   ;;  %s533_s2 = inlined_call_operand.hbm [shape: f32[256,128], index: 2, kind: input, shape index: {}]   ;;  %s534_s3 = inlined_call_operand.vmem [shape: f32[1,128], index: 3, kind: input, shape index: {}]   ;;  %s535_s4 = inlined_call_operand.hbm [shape: f32[16,128], index: 4, kind: output, shape index: {}]  }
   0x1   :  { %10 = vsyncpa [#allocation6], 0 }
   0x2   :  { %11 = vsyncpa [#allocation4], 0  ;;  %s473_s15 = smov [#allocation5]   ;;  %s474_s17 = smov [#allocation2]  }
   0x3   :  { %s29_s16 = sshll.u32 %s473_s15, 4  ;;  %s17_s18 = sshll.u32 %s474_s17, 4  ;;  %s30_s16 = int_to_ptr.vmem [resolvable:$true] %s29_s16  ;;  %s18_s18 = int_to_ptr.vmem [resolvable:$true] %s17_s18 }
   0x4   :  { %s395_s19 = scalar_lea.vmem %s30_s16, 256  ;;  %p400_p1 = scmp.lt.s32.totalorder %s30_s16, %s30_s16 }
   0x5   :  { %p396_p0 = scmp.ne.s32.totalorder %s30_s16, %s395_s19  ;;  %p401_p2 = scmp.lt.s32.totalorder %s395_s19, %s395_s19 }
   0x7   :  { %p402_p3 = por %p401_p2, %p400_p1 }
   0x9   :  { %p403_p4 = pnand %p402_p3, %p396_p0 }
   0xb   :  { %406 = shalt.err (!%p403_p4)
}
   0xc   :  { %s475_s20 = smov 128   ;;  %s476_s21 = smov 8  }
   0xd   :  { %35 = dma.hbm_to_vmem [thread:$0]  %s532_s1, 256, %s30_s16, [#allocation6], %s475_s20, %s475_s20, %s476_s21  }
   0xe   :  { %s415_s24 = scalar_lea.vmem %s18_s18, 256  ;;  %p420_p6 = scmp.lt.s32.totalorder %s18_s18, %s18_s18 }
   0xf   :  { %p416_p5 = scmp.ne.s32.totalorder %s18_s18, %s415_s24  ;;  %p421_p7 = scmp.lt.s32.totalorder %s415_s24, %s415_s24 }
  0x11   :  { %p422_p8 = por %p421_p7, %p420_p6 }
  0x13   :  { %p423_p9 = pnand %p422_p8, %p416_p5 }
  0x15   :  { %426 = shalt.err (!%p423_p9)
}
  0x16   :  { %23 = dma.hbm_to_vmem [thread:$0]  %s531_s0, 256, %s18_s18, [#allocation3], %s475_s20, %s475_s20, %s476_s21  }
  0x17   :  { %s477_s27 = smov [#allocation7]  }
  0x18   :  { %s41_s28 = sshll.u32 %s477_s27, 4  ;;  %s42_s28 = int_to_ptr.vmem [resolvable:$true] %s41_s28 }
  0x19   :  { %s435_s29 = scalar_lea.vmem %s42_s28, 4096  ;;  %p440_p11 = scmp.lt.s32.totalorder %s42_s28, %s42_s28 }
  0x1a   :  { %p436_p10 = scmp.ne.s32.totalorder %s42_s28, %s435_s29  ;;  %p441_p12 = scmp.lt.s32.totalorder %s435_s29, %s435_s29 }
  0x1c   :  { %p442_p13 = por %p441_p12, %p440_p11 }
  0x1e   :  { %p443_p0 = pnand %p442_p13, %p436_p10 }
  0x20   :  { %446 = shalt.err (!%p443_p0)
}
  0x21   :  { %47 = dma.hbm_to_vmem [thread:$0]  %s533_s2, 4096, %s42_s28, [#allocation6], %s475_s20, %s475_s20, %s476_s21  }
  0x22   :  { %467 = dma.done.wait [#allocation3], 256  }
  0x23   :  { %468 = vsyncadd [#allocation3], 4294967040 }
  0x24   :  { %469 = dma.done.wait [#allocation6], 4352  }
  0x25   :  { %470 = vsyncadd [#allocation6], 4294962944  ;;  %v94_v0 = vld [vmem:[#allocation7 + $0xf8] sm:$0xff]  ;;  %v93_v2 = vld [vmem:[#allocation7 + $0xf0] sm:$0xff]  ;;  %s478_s5 = smov [#allocation8]  }
  0x26   :  { %v76_v1 = vld [vmem:[#allocation7 + $0x78] sm:$0xff]  ;;  %311 = vmatprep.subr.mxu0 %v94_v0  ;;  %v75_v3 = vld [vmem:[#allocation7 + $0x70] sm:$0xff]  ;;  %v92_v4 = vld [vmem:[#allocation7 + $0xe8] sm:$0xff]  ;;  %s261_s6 = sshll.u32 %s478_s5, 4  ;;  %s262_s6 = int_to_ptr.vmem [resolvable:$true] %s261_s6 }
  0x27   :  { %346 = vmatprep.subr.mxu1 %v76_v1  ;;  %312 = vmatpush3.msra.mxu0 %v94_v0  ;;  %v74_v5 = vld [vmem:[#allocation7 + $0x68] sm:$0xff]  ;;  %v91_v6 = vld [vmem:[#allocation7 + $0xe0] sm:$0xff]  ;;  %v90_v8 = vld [vmem:[#allocation7 + $0xd8] sm:$0xff]  ;;  %s447_s7 = scalar_lea.vmem %s262_s6, 256  ;;  %p452_p2 = scmp.lt.s32.totalorder %s262_s6, %s262_s6 }
  0x28   :  { %347 = vmatpush3.msra.mxu1 %v76_v1  ;;  %313 = vmatprep.subr.mxu0 %v93_v2  ;;  %v73_v7 = vld [vmem:[#allocation7 + $0x60] sm:$0xff]  ;;  %v72_v9 = vld [vmem:[#allocation7 + $0x58] sm:$0xff]  ;;  %v89_v10 = vld [vmem:[#allocation7 + $0xd0] sm:$0xff]  ;;  %p448_p1 = scmp.ne.s32.totalorder %s262_s6, %s447_s7  ;;  %p453_p3 = scmp.lt.s32.totalorder %s447_s7, %s447_s7 }
  0x29   :  { %348 = vmatprep.subr.mxu1 %v75_v3  ;;  %314 = vmatpush3.msra.mxu0 %v93_v2  ;;  %v71_v11 = vld [vmem:[#allocation7 + $0x50] sm:$0xff]  ;;  %v88_v12 = vld [vmem:[#allocation7 + $0xc8] sm:$0xff]  ;;  %v87_v14 = vld [vmem:[#allocation7 + $0xc0] sm:$0xff] }
  0x2a   :  { %349 = vmatpush3.msra.mxu1 %v75_v3  ;;  %315 = vmatprep.subr.mxu0 %v92_v4  ;;  %v70_v13 = vld [vmem:[#allocation7 + $0x48] sm:$0xff]  ;;  %v69_v15 = vld [vmem:[#allocation7 + $0x40] sm:$0xff]  ;;  %v86_v16 = vld [vmem:[#allocation7 + $0xb8] sm:$0xff]  ;;  %p454_p4 = por %p453_p3, %p452_p2 }
  0x2b   :  { %350 = vmatprep.subr.mxu1 %v74_v5  ;;  %316 = vmatpush3.msra.mxu0 %v92_v4  ;;  %v68_v17 = vld [vmem:[#allocation7 + $0x38] sm:$0xff]  ;;  %v85_v18 = vld [vmem:[#allocation7 + $0xb0] sm:$0xff]  ;;  %v84_v20 = vld [vmem:[#allocation7 + $0xa8] sm:$0xff] }
  0x2c   :  { %351 = vmatpush3.msra.mxu1 %v74_v5  ;;  %317 = vmatprep.subr.mxu0 %v91_v6  ;;  %v67_v19 = vld [vmem:[#allocation7 + $0x30] sm:$0xff]  ;;  %v66_v21 = vld [vmem:[#allocation7 + $0x28] sm:$0xff]  ;;  %v83_v22 = vld [vmem:[#allocation7 + $0xa0] sm:$0xff]  ;;  %p455_p5 = pnand %p454_p4, %p448_p1 }
  0x2d   :  { %352 = vmatprep.subr.mxu1 %v73_v7  ;;  %318 = vmatpush3.msra.mxu0 %v91_v6  ;;  %v65_v23 = vld [vmem:[#allocation7 + $0x20] sm:$0xff]  ;;  %v82_v24 = vld [vmem:[#allocation7 + $0x98] sm:$0xff]  ;;  %v81_v26 = vld [vmem:[#allocation7 + $0x90] sm:$0xff] }
  0x2e   :  { %353 = vmatpush3.msra.mxu1 %v73_v7  ;;  %319 = vmatprep.subr.mxu0 %v90_v8  ;;  %v64_v25 = vld [vmem:[#allocation7 + $0x18] sm:$0xff]  ;;  %v63_v27 = vld [vmem:[#allocation7 + $0x10] sm:$0xff]  ;;  %v80_v28 = vld [vmem:[#allocation7 + $0x88] sm:$0xff] }
  0x2f   :  { %354 = vmatprep.subr.mxu1 %v72_v9  ;;  %320 = vmatpush3.msra.mxu0 %v90_v8  ;;  %v62_v29 = vld [vmem:[#allocation7 + $0x8] sm:$0xff]  ;;  %v79_v30 = vld [vmem:[#allocation7 + $0x80] sm:$0xff]  ;;  %v77_v32 = vld [vmem:[#allocation5] sm:$0xff] }
  0x30   :  { %355 = vmatpush3.msra.mxu1 %v72_v9  ;;  %321 = vmatprep.subr.mxu0 %v89_v10  ;;  %v61_v31 = vld [vmem:[#allocation7] sm:$0xff]  ;;  %v78_v34 = vld [vmem:[#allocation5 + $0x8] sm:$0xff]  ;;  %v60_v35 = vld [vmem:[#allocation2 + $0x8] sm:$0xff] }
  0x31   :  { %356 = vmatprep.subr.mxu1 %v71_v11  ;;  %322 = vmatpush3.msra.mxu0 %v89_v10  ;;  %v59_v33 = vld [vmem:[#allocation2] sm:$0xff] }
  0x32   :  { %357 = vmatpush3.msra.mxu1 %v71_v11  ;;  %323 = vmatprep.subr.mxu0 %v88_v12  ;;  %v274_v38 = vld [vmem:[%s534_s3] ss:$0 sm:$0xff] }
  0x33   :  { %358 = vmatprep.subr.mxu1 %v70_v13  ;;  %324 = vmatpush3.msra.mxu0 %v88_v12 }
  0x34   :  { %359 = vmatpush3.msra.mxu1 %v70_v13  ;;  %325 = vmatprep.subr.mxu0 %v87_v14 }
  0x35   :  { %360 = vmatprep.subr.mxu1 %v69_v15  ;;  %326 = vmatpush3.msra.mxu0 %v87_v14 }
  0x36   :  { %361 = vmatpush3.msra.mxu1 %v69_v15  ;;  %327 = vmatprep.subr.mxu0 %v86_v16 }
  0x37   :  { %362 = vmatprep.subr.mxu1 %v68_v17  ;;  %328 = vmatpush3.msra.mxu0 %v86_v16 }
  0x38   :  { %363 = vmatpush3.msra.mxu1 %v68_v17  ;;  %329 = vmatprep.subr.mxu0 %v85_v18 }
  0x39   :  { %364 = vmatprep.subr.mxu1 %v67_v19  ;;  %330 = vmatpush3.msra.mxu0 %v85_v18 }
  0x3a   :  { %365 = vmatpush3.msra.mxu1 %v67_v19  ;;  %331 = vmatprep.subr.mxu0 %v84_v20 }
  0x3b   :  { %366 = vmatprep.subr.mxu1 %v66_v21  ;;  %332 = vmatpush3.msra.mxu0 %v84_v20 }
  0x3c   :  { %367 = vmatpush3.msra.mxu1 %v66_v21  ;;  %333 = vmatprep.subr.mxu0 %v83_v22 }
  0x3d   :  { %368 = vmatprep.subr.mxu1 %v65_v23  ;;  %334 = vmatpush3.msra.mxu0 %v83_v22 }
  0x3e   :  { %369 = vmatpush3.msra.mxu1 %v65_v23  ;;  %335 = vmatprep.subr.mxu0 %v82_v24 }
  0x3f   :  { %370 = vmatprep.subr.mxu1 %v64_v25  ;;  %336 = vmatpush3.msra.mxu0 %v82_v24 }
  0x40   :  { %371 = vmatpush3.msra.mxu1 %v64_v25  ;;  %337 = vmatprep.subr.mxu0 %v81_v26 }
  0x41   :  { %372 = vmatprep.subr.mxu1 %v63_v27  ;;  %338 = vmatpush3.msra.mxu0 %v81_v26 }
  0x42   :  { %373 = vmatpush3.msra.mxu1 %v63_v27  ;;  %339 = vmatprep.subr.mxu0 %v80_v28 }
  0x43   :  { %374 = vmatprep.subr.mxu1 %v62_v29  ;;  %340 = vmatpush3.msra.mxu0 %v80_v28 }
  0x44   :  { %375 = vmatpush3.msra.mxu1 %v62_v29  ;;  %341 = vmatprep.subr.mxu0 %v79_v30 }
  0x45   :  { %376 = vmatprep.subr.mxu1 %v61_v31  ;;  %342 = vmatpush3.msra.mxu0 %v79_v30 }
  0x46   :  { %343 = vmatprep.mubr.f32.mxu0 %v77_v32  ;;  %377 = vmatpush3.msra.mxu1 %v61_v31 }
  0x47   :  { %378 = vmatprep.mubr.f32.mxu1 %v59_v33  ;;  %344 = vmatmul.mubr.f32.vlgmr.msra.gmra.mxu0 %v78_v34 }
  0x48   :  { %379 = vmatmul.mubr.f32.vlgmr.msra.gmra.mxu1 %v60_v35 }
 0x107   :  { %v345_v36 = vpop.f32.mrf.mxu0 }
 0x108   :  { %v380_v37 = vpop.f32.mrf.mxu1 }
 0x109   :  { %v242_v39 = vadd.f32 %v380_v37, %v345_v36  ;;  %v161_v40 = vpop.f32.mrf.mxu0 }
 0x10a   :  { %v236_v41 = vpop.f32.mrf.mxu1 }
 0x10b   :  { %v253_v42 = vadd.f32 %v274_v38, %v242_v39  ;;  %v237_v43 = vadd.f32 %v236_v41, %v161_v40 }
 0x10d   :  { %255 = vst [vmem:[#allocation8 + $0x8] sm:$0xff] %v253_v42  ;;  %v252_v44 = vadd.f32 %v274_v38, %v237_v43 }
 0x10f   :  { %254 = vst [vmem:[#allocation8] sm:$0xff] %v252_v44 }
 0x110   :  { %458 = shalt.err (!%p455_p5)
}
 0x111   :  { %267 = dma.vmem_to_hbm [thread:$0]  %s262_s6, 256, %s535_s4, [#allocation4], %s475_s20, %s475_s20, %s476_s21  }
 0x112   :  { %471 = dma.done.wait [#allocation4], 256  }
 0x113   :  { %472 = vsyncadd [#allocation4], 4294967040 }
 0x114   :  { %271 = vsyncpa [#allocation3], 1 }
 0x115   :  { %272 = vsyncpa [#allocation6], 1 }
 0x116   :  { %273 = vsyncpa [#allocation4], 1 }

</bundles_post_ra>
